<compile_context>
chip_gen: v7x
topology: tpu7x:2x2x1
jax: 0.10.0
libtpu: 0.0.40
codegen_flags: <defaults>
</compile_context>

<pallas_src>
import jax
import jax.numpy as jnp
from jax.experimental import pallas as pl
from jax.experimental.pallas import tpu as pltpu


INPUT_DIM = 43
HIDDEN_DIMS = [40, 35]
LATENT_DIM = 30
OUT_LANES = 128                      # lane-dense packed output width
_PACK_USED = INPUT_DIM + 2 * LATENT_DIM   # 103 lanes actually carry data


def _round_up(n, m):
    return ((n + m - 1) // m) * m


def _vae_kernel(
    x_ref, eps_ref,
    w_e0, b_e0, w_e1, b_e1,              # encoder
    w_ml, b_ml,                          # fused mu / log_var head (35 -> 60)
    w_d0, b_d0, w_d1, b_d1, w_d2, b_d2,  # decoder
    out_ref,                             # (TILE_B, 128) packed slab
):
    x = x_ref[...]

    # ---------------- Encoder ----------------
    # Linear(43->40) + Dropout(identity) + ReLU
    h = jnp.dot(x, w_e0[...], preferred_element_type=jnp.float32) + b_e0[...]
    h = jnp.maximum(h, 0.0)
    # Linear(40->35) + Dropout(identity) + ReLU
    h = jnp.dot(h, w_e1[...], preferred_element_type=jnp.float32) + b_e1[...]
    h = jnp.maximum(h, 0.0)

    # ---------------- Fused latent heads ----------------
    ml = jnp.dot(h, w_ml[...], preferred_element_type=jnp.float32) + b_ml[...]
    mu = ml[:, :LATENT_DIM]
    log_var = ml[:, LATENT_DIM:2 * LATENT_DIM]
    sigma = jnp.exp(0.5 * log_var)

    # Reparameterization: Z = mu + sigma * eps  (f32)
    z = mu + sigma * eps_ref[...]

    # ---------------- Decoder ----------------
    # Linear(30->35)  (no activation)
    d = jnp.dot(z, w_d0[...], preferred_element_type=jnp.float32) + b_d0[...]
    # Linear(35->40) + ReLU
    d = jnp.dot(d, w_d1[...], preferred_element_type=jnp.float32) + b_d1[...]
    d = jnp.maximum(d, 0.0)
    # Linear(40->43) + ReLU  (matches the PyTorch module, which ends in ReLU)
    d = jnp.dot(d, w_d2[...], preferred_element_type=jnp.float32) + b_d2[...]
    d = jnp.maximum(d, 0.0)

    # ---------------- Lane-dense packed output ----------------
    out_ref[...] = jnp.zeros(out_ref.shape, jnp.float32)
    out_ref[:, 0:INPUT_DIM] = d
    out_ref[:, INPUT_DIM:INPUT_DIM + LATENT_DIM] = mu
    out_ref[:, INPUT_DIM + LATENT_DIM:_PACK_USED] = sigma


def _init_linear(key, fan_in, fan_out):
    """PyTorch-style nn.Linear default init (Kaiming-uniform), deterministic."""
    k_w, k_b = jax.random.split(key)
    bound = 1.0 / jnp.sqrt(fan_in)
    # stored as (in_features, out_features)
    w = jax.random.uniform(k_w, (fan_in, fan_out), jnp.float32, -bound, bound)
    b = jax.random.uniform(k_b, (1, fan_out), jnp.float32, -bound, bound)
    return w, b


def make_params(key):
    keys = jax.random.split(key, 7)
    params = []
    # Encoder: 43->40, 40->35
    params += _init_linear(keys[0], INPUT_DIM, HIDDEN_DIMS[0])
    params += _init_linear(keys[1], HIDDEN_DIMS[0], HIDDEN_DIMS[1])
    # mu / log_var heads: 35->30
    params += _init_linear(keys[2], HIDDEN_DIMS[1], LATENT_DIM)
    params += _init_linear(keys[3], HIDDEN_DIMS[1], LATENT_DIM)
    # Decoder: 30->35, 35->40 (+ReLU), 40->43 (+ReLU)
    params += _init_linear(keys[4], LATENT_DIM, HIDDEN_DIMS[1])
    params += _init_linear(keys[5], HIDDEN_DIMS[1], HIDDEN_DIMS[0])
    params += _init_linear(keys[6], HIDDEN_DIMS[0], INPUT_DIM)
    return tuple(params)


def vae_forward(x, eps, params, *, tile_b=1024):
    """x: (B, 43) f32, eps: (B, 30) f32 standard-normal sample.

    Returns (X_reconstructed, mu, sigma)."""
    (w_e0, b_e0, w_e1, b_e1, w_mu, b_mu, w_lv, b_lv,
     w_d0, b_d0, w_d1, b_d1, w_d2, b_d2) = params

    # Fuse the mu / log_var heads into one matmul (same K, concatenated N).
    w_ml = jnp.concatenate([w_mu, w_lv], axis=1)     # (35, 60)
    b_ml = jnp.concatenate([b_mu, b_lv], axis=1)     # (1, 60)
    weights = (w_e0, b_e0, w_e1, b_e1, w_ml, b_ml,
               w_d0, b_d0, w_d1, b_d1, w_d2, b_d2)

    B = x.shape[0]
    # Batch tile: multiple of 8, no larger than needed for small batches.
    tb = min(tile_b, _round_up(B, 8))
    b_pad = _round_up(B, tb)
    if b_pad != B:
        x = jnp.pad(x, ((0, b_pad - B), (0, 0)))
        eps = jnp.pad(eps, ((0, b_pad - B), (0, 0)))

    grid = (b_pad // tb,)

    in_specs = [
        pl.BlockSpec((tb, INPUT_DIM), lambda i: (i, 0)),      # x tile
        pl.BlockSpec((tb, LATENT_DIM), lambda i: (i, 0)),     # eps tile
    ]
    # Weights / biases: same block every grid step -> stay VMEM-resident.
    in_specs += [pl.BlockSpec(w.shape, lambda i: (0, 0)) for w in weights]

    out_spec = pl.BlockSpec((tb, OUT_LANES), lambda i: (i, 0))

    slab = pl.pallas_call(
        _vae_kernel,
        out_shape=jax.ShapeDtypeStruct((b_pad, OUT_LANES), jnp.float32),
        grid=grid,
        in_specs=in_specs,
        out_specs=out_spec,
        compiler_params=pltpu.CompilerParams(
            dimension_semantics=("parallel",)),   # batch-parallel (2 TCs on v7x)
    )(x, eps, *weights)

    x_rec = slab[:B, 0:INPUT_DIM]
    mu = slab[:B, INPUT_DIM:INPUT_DIM + LATENT_DIM]
    sigma = slab[:B, INPUT_DIM + LATENT_DIM:_PACK_USED]
    return x_rec, mu, sigma


def vae_forward_ref(x, eps, params):
    """Pure-JAX reference for correctness check."""
    (w_e0, b_e0, w_e1, b_e1, w_mu, b_mu, w_lv, b_lv,
     w_d0, b_d0, w_d1, b_d1, w_d2, b_d2) = params
    h = jnp.maximum(x @ w_e0 + b_e0, 0.0)
    h = jnp.maximum(h @ w_e1 + b_e1, 0.0)
    mu = h @ w_mu + b_mu
    log_var = h @ w_lv + b_lv
    sigma = jnp.exp(0.5 * log_var)
    z = mu + sigma * eps
    d = z @ w_d0 + b_d0
    d = jnp.maximum(d @ w_d1 + b_d1, 0.0)
    d = jnp.maximum(d @ w_d2 + b_d2, 0.0)
    return d, mu, sigma


if __name__ == "__main__":
    key = jax.random.PRNGKey(0)
    k_params, k_x, k_eps = jax.random.split(key, 3)

    B = 8  # small batch, aligned to 8 sublanes
    params = make_params(k_params)
    x = jax.random.normal(k_x, (B, INPUT_DIM), jnp.float32)
    eps = jax.random.normal(k_eps, (B, LATENT_DIM), jnp.float32)

    x_rec, mu, sigma = vae_forward(x, eps, params)
    jax.block_until_ready((x_rec, mu, sigma))

    # correctness check against pure-JAX reference
    x_rec_r, mu_r, sigma_r = vae_forward_ref(x, eps, params)
    assert x_rec.shape == (B, INPUT_DIM)
    assert mu.shape == (B, LATENT_DIM)
    assert sigma.shape == (B, LATENT_DIM)
    assert jnp.allclose(x_rec, x_rec_r, atol=1e-5, rtol=1e-5)
    assert jnp.allclose(mu, mu_r, atol=1e-5, rtol=1e-5)
    assert jnp.allclose(sigma, sigma_r, atol=1e-5, rtol=1e-5)

    print("KERNEL_OK")
</pallas_src>

<mosaic_0001>
module attributes {stable_mosaic.version = 11 : i64} {
  func.func @_vae_kernel(%arg0: i32, %arg1: memref<8x43xf32, #tpu.memory_space<vmem>>, %arg2: memref<8x30xf32, #tpu.memory_space<vmem>>, %arg3: memref<43x40xf32, #tpu.memory_space<vmem>>, %arg4: memref<1x40xf32, #tpu.memory_space<vmem>>, %arg5: memref<40x35xf32, #tpu.memory_space<vmem>>, %arg6: memref<1x35xf32, #tpu.memory_space<vmem>>, %arg7: memref<35x60xf32, #tpu.memory_space<vmem>>, %arg8: memref<1x60xf32, #tpu.memory_space<vmem>>, %arg9: memref<30x35xf32, #tpu.memory_space<vmem>>, %arg10: memref<1x35xf32, #tpu.memory_space<vmem>>, %arg11: memref<35x40xf32, #tpu.memory_space<vmem>>, %arg12: memref<1x40xf32, #tpu.memory_space<vmem>>, %arg13: memref<40x43xf32, #tpu.memory_space<vmem>>, %arg14: memref<1x43xf32, #tpu.memory_space<vmem>>, %arg15: memref<8x128xf32, #tpu.memory_space<vmem>>) attributes {dimension_semantics = [#tpu.dimension_semantics<parallel>], iteration_bounds = array<i64: 1>, scalar_prefetch = 0 : i64, scratch_operands = 0 : i64, tpu.core_type = #tpu.core_type<tc>, window_params = [{transform_indices = @transform_0, window_bounds = array<i64: 8, 43>}, {transform_indices = @transform_1, window_bounds = array<i64: 8, 30>}, {pipeline_mode = #tpu.pipeline_mode<synchronous>, transform_indices = @transform_2, window_bounds = array<i64: 43, 40>}, {pipeline_mode = #tpu.pipeline_mode<synchronous>, transform_indices = @transform_3, window_bounds = array<i64: 1, 40>}, {pipeline_mode = #tpu.pipeline_mode<synchronous>, transform_indices = @transform_4, window_bounds = array<i64: 40, 35>}, {pipeline_mode = #tpu.pipeline_mode<synchronous>, transform_indices = @transform_5, window_bounds = array<i64: 1, 35>}, {pipeline_mode = #tpu.pipeline_mode<synchronous>, transform_indices = @transform_6, window_bounds = array<i64: 35, 60>}, {pipeline_mode = #tpu.pipeline_mode<synchronous>, transform_indices = @transform_7, window_bounds = array<i64: 1, 60>}, {pipeline_mode = #tpu.pipeline_mode<synchronous>, transform_indices = @transform_8, window_bounds = array<i64: 30, 35>}, {pipeline_mode = #tpu.pipeline_mode<synchronous>, transform_indices = @transform_9, window_bounds = array<i64: 1, 35>}, {pipeline_mode = #tpu.pipeline_mode<synchronous>, transform_indices = @transform_10, window_bounds = array<i64: 35, 40>}, {pipeline_mode = #tpu.pipeline_mode<synchronous>, transform_indices = @transform_11, window_bounds = array<i64: 1, 40>}, {pipeline_mode = #tpu.pipeline_mode<synchronous>, transform_indices = @transform_12, window_bounds = array<i64: 40, 43>}, {pipeline_mode = #tpu.pipeline_mode<synchronous>, transform_indices = @transform_13, window_bounds = array<i64: 1, 43>}, {transform_indices = @transform_14, window_bounds = array<i64: 8, 128>}]} {
    %c0 = arith.constant 0 : index
    %c0_0 = arith.constant 0 : index
    %0 = vector.load %arg1[%c0, %c0_0] : memref<8x43xf32, #tpu.memory_space<vmem>>, vector<8x43xf32>
    %c0_1 = arith.constant 0 : index
    %c0_2 = arith.constant 0 : index
    %1 = vector.load %arg3[%c0_1, %c0_2] : memref<43x40xf32, #tpu.memory_space<vmem>>, vector<43x40xf32>
    %cst = arith.constant dense<0.000000e+00> : vector<8x40xf32>
    %2 = tpu.matmul %0, %1, %cst {dimension_numbers = #tpu.dot_dimension_numbers<[1], [0], [0], [1], [0, 0, 1, 1], [], []>} : vector<8x43xf32>, vector<43x40xf32>, vector<8x40xf32> -> vector<8x40xf32>
    %c0_3 = arith.constant 0 : index
    %c0_4 = arith.constant 0 : index
    %3 = vector.load %arg4[%c0_3, %c0_4] : memref<1x40xf32, #tpu.memory_space<vmem>>, vector<1x40xf32>
    %4 = vector.broadcast %3 : vector<1x40xf32> to vector<8x40xf32>
    %5 = arith.addf %2, %4 : vector<8x40xf32>
    %cst_5 = arith.constant 0.000000e+00 : f32
    %6 = vector.broadcast %cst_5 : f32 to vector<8x40xf32>
    %7 = arith.maximumf %5, %6 : vector<8x40xf32>
    %c0_6 = arith.constant 0 : index
    %c0_7 = arith.constant 0 : index
    %8 = vector.load %arg5[%c0_6, %c0_7] : memref<40x35xf32, #tpu.memory_space<vmem>>, vector<40x35xf32>
    %cst_8 = arith.constant dense<0.000000e+00> : vector<8x35xf32>
    %9 = tpu.matmul %7, %8, %cst_8 {dimension_numbers = #tpu.dot_dimension_numbers<[1], [0], [0], [1], [0, 0, 1, 1], [], []>} : vector<8x40xf32>, vector<40x35xf32>, vector<8x35xf32> -> vector<8x35xf32>
    %c0_9 = arith.constant 0 : index
    %c0_10 = arith.constant 0 : index
    %10 = vector.load %arg6[%c0_9, %c0_10] : memref<1x35xf32, #tpu.memory_space<vmem>>, vector<1x35xf32>
    %11 = vector.broadcast %10 : vector<1x35xf32> to vector<8x35xf32>
    %12 = arith.addf %9, %11 : vector<8x35xf32>
    %cst_11 = arith.constant 0.000000e+00 : f32
    %13 = vector.broadcast %cst_11 : f32 to vector<8x35xf32>
    %14 = arith.maximumf %12, %13 : vector<8x35xf32>
    %c0_12 = arith.constant 0 : index
    %c0_13 = arith.constant 0 : index
    %15 = vector.load %arg7[%c0_12, %c0_13] : memref<35x60xf32, #tpu.memory_space<vmem>>, vector<35x60xf32>
    %cst_14 = arith.constant dense<0.000000e+00> : vector<8x60xf32>
    %16 = tpu.matmul %14, %15, %cst_14 {dimension_numbers = #tpu.dot_dimension_numbers<[1], [0], [0], [1], [0, 0, 1, 1], [], []>} : vector<8x35xf32>, vector<35x60xf32>, vector<8x60xf32> -> vector<8x60xf32>
    %c0_15 = arith.constant 0 : index
    %c0_16 = arith.constant 0 : index
    %17 = vector.load %arg8[%c0_15, %c0_16] : memref<1x60xf32, #tpu.memory_space<vmem>>, vector<1x60xf32>
    %18 = vector.broadcast %17 : vector<1x60xf32> to vector<8x60xf32>
    %19 = arith.addf %16, %18 : vector<8x60xf32>
    %20 = vector.extract_strided_slice %19 {offsets = [0, 0], sizes = [8, 30], strides = [1, 1]} : vector<8x60xf32> to vector<8x30xf32>
    %21 = vector.extract_strided_slice %19 {offsets = [0, 30], sizes = [8, 30], strides = [1, 1]} : vector<8x60xf32> to vector<8x30xf32>
    %cst_17 = arith.constant 5.000000e-01 : f32
    %22 = vector.broadcast %cst_17 : f32 to vector<8x30xf32>
    %23 = arith.mulf %22, %21 : vector<8x30xf32>
    %24 = math.exp %23 : vector<8x30xf32>
    %c0_18 = arith.constant 0 : index
    %c0_19 = arith.constant 0 : index
    %25 = vector.load %arg2[%c0_18, %c0_19] : memref<8x30xf32, #tpu.memory_space<vmem>>, vector<8x30xf32>
    %26 = arith.mulf %24, %25 : vector<8x30xf32>
    %27 = arith.addf %20, %26 : vector<8x30xf32>
    %c0_20 = arith.constant 0 : index
    %c0_21 = arith.constant 0 : index
    %28 = vector.load %arg9[%c0_20, %c0_21] : memref<30x35xf32, #tpu.memory_space<vmem>>, vector<30x35xf32>
    %cst_22 = arith.constant dense<0.000000e+00> : vector<8x35xf32>
    %29 = tpu.matmul %27, %28, %cst_22 {dimension_numbers = #tpu.dot_dimension_numbers<[1], [0], [0], [1], [0, 0, 1, 1], [], []>} : vector<8x30xf32>, vector<30x35xf32>, vector<8x35xf32> -> vector<8x35xf32>
    %c0_23 = arith.constant 0 : index
    %c0_24 = arith.constant 0 : index
    %30 = vector.load %arg10[%c0_23, %c0_24] : memref<1x35xf32, #tpu.memory_space<vmem>>, vector<1x35xf32>
    %31 = vector.broadcast %30 : vector<1x35xf32> to vector<8x35xf32>
    %32 = arith.addf %29, %31 : vector<8x35xf32>
    %c0_25 = arith.constant 0 : index
    %c0_26 = arith.constant 0 : index
    %33 = vector.load %arg11[%c0_25, %c0_26] : memref<35x40xf32, #tpu.memory_space<vmem>>, vector<35x40xf32>
    %cst_27 = arith.constant dense<0.000000e+00> : vector<8x40xf32>
    %34 = tpu.matmul %32, %33, %cst_27 {dimension_numbers = #tpu.dot_dimension_numbers<[1], [0], [0], [1], [0, 0, 1, 1], [], []>} : vector<8x35xf32>, vector<35x40xf32>, vector<8x40xf32> -> vector<8x40xf32>
    %c0_28 = arith.constant 0 : index
    %c0_29 = arith.constant 0 : index
    %35 = vector.load %arg12[%c0_28, %c0_29] : memref<1x40xf32, #tpu.memory_space<vmem>>, vector<1x40xf32>
    %36 = vector.broadcast %35 : vector<1x40xf32> to vector<8x40xf32>
    %37 = arith.addf %34, %36 : vector<8x40xf32>
    %cst_30 = arith.constant 0.000000e+00 : f32
    %38 = vector.broadcast %cst_30 : f32 to vector<8x40xf32>
    %39 = arith.maximumf %37, %38 : vector<8x40xf32>
    %c0_31 = arith.constant 0 : index
    %c0_32 = arith.constant 0 : index
    %40 = vector.load %arg13[%c0_31, %c0_32] : memref<40x43xf32, #tpu.memory_space<vmem>>, vector<40x43xf32>
    %cst_33 = arith.constant dense<0.000000e+00> : vector<8x43xf32>
    %41 = tpu.matmul %39, %40, %cst_33 {dimension_numbers = #tpu.dot_dimension_numbers<[1], [0], [0], [1], [0, 0, 1, 1], [], []>} : vector<8x40xf32>, vector<40x43xf32>, vector<8x43xf32> -> vector<8x43xf32>
    %c0_34 = arith.constant 0 : index
    %c0_35 = arith.constant 0 : index
    %42 = vector.load %arg14[%c0_34, %c0_35] : memref<1x43xf32, #tpu.memory_space<vmem>>, vector<1x43xf32>
    %43 = vector.broadcast %42 : vector<1x43xf32> to vector<8x43xf32>
    %44 = arith.addf %41, %43 : vector<8x43xf32>
    %cst_36 = arith.constant 0.000000e+00 : f32
    %45 = vector.broadcast %cst_36 : f32 to vector<8x43xf32>
    %46 = arith.maximumf %44, %45 : vector<8x43xf32>
    %cst_37 = arith.constant 0.000000e+00 : f32
    %47 = vector.broadcast %cst_37 : f32 to vector<8x128xf32>
    %c0_38 = arith.constant 0 : index
    %c0_39 = arith.constant 0 : index
    %48 = vector.load %arg15[%c0_38, %c0_39] : memref<8x128xf32, #tpu.memory_space<vmem>>, vector<8x128xf32>
    tpu.vector_store %arg15[%c0_38, %c0_39], %47 {strides = array<i32>} : memref<8x128xf32, #tpu.memory_space<vmem>>, vector<8x128xf32>,
    %c0_40 = arith.constant 0 : index
    %c0_41 = arith.constant 0 : index
    %49 = vector.load %arg15[%c0_40, %c0_41] : memref<8x128xf32, #tpu.memory_space<vmem>>, vector<8x43xf32>
    tpu.vector_store %arg15[%c0_40, %c0_41], %46 {strides = array<i32>} : memref<8x128xf32, #tpu.memory_space<vmem>>, vector<8x43xf32>,
    %c0_42 = arith.constant 0 : index
    %c43 = arith.constant 43 : index
    %50 = vector.load %arg15[%c0_42, %c43] : memref<8x128xf32, #tpu.memory_space<vmem>>, vector<8x30xf32>
    tpu.vector_store %arg15[%c0_42, %c43], %20 {strides = array<i32>} : memref<8x128xf32, #tpu.memory_space<vmem>>, vector<8x30xf32>,
    %c0_43 = arith.constant 0 : index
    %c73 = arith.constant 73 : index
    %51 = vector.load %arg15[%c0_43, %c73] : memref<8x128xf32, #tpu.memory_space<vmem>>, vector<8x30xf32>
    tpu.vector_store %arg15[%c0_43, %c73], %24 {strides = array<i32>} : memref<8x128xf32, #tpu.memory_space<vmem>>, vector<8x30xf32>,
    return
  }
  func.func @transform_0(%arg0: i32) -> (i32, i32) {
    %c0_i32 = arith.constant 0 : i32
    %c0_i32_0 = arith.constant 0 : i32
    return %arg0, %c0_i32 : i32, i32
  }
  func.func @transform_1(%arg0: i32) -> (i32, i32) {
    %c0_i32 = arith.constant 0 : i32
    %c0_i32_0 = arith.constant 0 : i32
    return %arg0, %c0_i32 : i32, i32
  }
  func.func @transform_2(%arg0: i32) -> (i32, i32) {
    %c0_i32 = arith.constant 0 : i32
    %c0_i32_0 = arith.constant 0 : i32
    %c0_i32_1 = arith.constant 0 : i32
    return %c0_i32, %c0_i32_0 : i32, i32
  }
  func.func @transform_3(%arg0: i32) -> (i32, i32) {
    %c0_i32 = arith.constant 0 : i32
    %c0_i32_0 = arith.constant 0 : i32
    %c0_i32_1 = arith.constant 0 : i32
    return %c0_i32, %c0_i32_0 : i32, i32
  }
  func.func @transform_4(%arg0: i32) -> (i32, i32) {
    %c0_i32 = arith.constant 0 : i32
    %c0_i32_0 = arith.constant 0 : i32
    %c0_i32_1 = arith.constant 0 : i32
    return %c0_i32, %c0_i32_0 : i32, i32
  }
  func.func @transform_5(%arg0: i32) -> (i32, i32) {
    %c0_i32 = arith.constant 0 : i32
    %c0_i32_0 = arith.constant 0 : i32
    %c0_i32_1 = arith.constant 0 : i32
    return %c0_i32, %c0_i32_0 : i32, i32
  }
  func.func @transform_6(%arg0: i32) -> (i32, i32) {
    %c0_i32 = arith.constant 0 : i32
    %c0_i32_0 = arith.constant 0 : i32
    %c0_i32_1 = arith.constant 0 : i32
    return %c0_i32, %c0_i32_0 : i32, i32
  }
  func.func @transform_7(%arg0: i32) -> (i32, i32) {
    %c0_i32 = arith.constant 0 : i32
    %c0_i32_0 = arith.constant 0 : i32
    %c0_i32_1 = arith.constant 0 : i32
    return %c0_i32, %c0_i32_0 : i32, i32
  }
  func.func @transform_8(%arg0: i32) -> (i32, i32) {
    %c0_i32 = arith.constant 0 : i32
    %c0_i32_0 = arith.constant 0 : i32
    %c0_i32_1 = arith.constant 0 : i32
    return %c0_i32, %c0_i32_0 : i32, i32
  }
  func.func @transform_9(%arg0: i32) -> (i32, i32) {
    %c0_i32 = arith.constant 0 : i32
    %c0_i32_0 = arith.constant 0 : i32
    %c0_i32_1 = arith.constant 0 : i32
    return %c0_i32, %c0_i32_0 : i32, i32
  }
  func.func @transform_10(%arg0: i32) -> (i32, i32) {
    %c0_i32 = arith.constant 0 : i32
    %c0_i32_0 = arith.constant 0 : i32
    %c0_i32_1 = arith.constant 0 : i32
    return %c0_i32, %c0_i32_0 : i32, i32
  }
  func.func @transform_11(%arg0: i32) -> (i32, i32) {
    %c0_i32 = arith.constant 0 : i32
    %c0_i32_0 = arith.constant 0 : i32
    %c0_i32_1 = arith.constant 0 : i32
    return %c0_i32, %c0_i32_0 : i32, i32
  }
  func.func @transform_12(%arg0: i32) -> (i32, i32) {
    %c0_i32 = arith.constant 0 : i32
    %c0_i32_0 = arith.constant 0 : i32
    %c0_i32_1 = arith.constant 0 : i32
    return %c0_i32, %c0_i32_0 : i32, i32
  }
  func.func @transform_13(%arg0: i32) -> (i32, i32) {
    %c0_i32 = arith.constant 0 : i32
    %c0_i32_0 = arith.constant 0 : i32
    %c0_i32_1 = arith.constant 0 : i32
    return %c0_i32, %c0_i32_0 : i32, i32
  }
  func.func @transform_14(%arg0: i32) -> (i32, i32) {
    %c0_i32 = arith.constant 0 : i32
    %c0_i32_0 = arith.constant 0 : i32
    return %arg0, %c0_i32 : i32, i32
  }
}

</mosaic_0001>

<bundles_post_ra>
// kernel: tpu_custom_call.1
= control target key start
LH: loop header
LB: loop body
LE: loop exit
PB: predicated region body
PF: predicated region fallthrough
CT: control target
= control target key end

     0   :  { %19 = vsyncpa [#allocation3], 0  ;;  %s1365_s0 = inlined_call_operand.hbm [shape: f32[8,43], index: 0, kind: input, shape index: {}]   ;;  %s1366_s1 = inlined_call_operand.hbm [shape: f32[8,30], index: 1, kind: input, shape index: {}]   ;;  %s1367_s2 = inlined_call_operand.vmem [shape: f32[43,40], index: 2, kind: input, shape index: {}]   ;;  %s1368_s3 = inlined_call_operand.vmem [shape: f32[1,40], index: 3, kind: input, shape index: {}]   ;;  %s1369_s4 = inlined_call_operand.vmem [shape: f32[40,35], index: 4, kind: input, shape index: {}]   ;;  %s1370_s5 = inlined_call_operand.vmem [shape: f32[1,35], index: 5, kind: input, shape index: {}]   ;;  %s1371_s6 = inlined_call_operand.vmem [shape: f32[35,60], index: 6, kind: input, shape index: {}]   ;;  %s1372_s7 = inlined_call_operand.hbm [shape: f32[1,60], index: 7, kind: input, shape index: {}]   ;;  %s1373_s8 = inlined_call_operand.hbm [shape: f32[30,35], index: 8, kind: input, shape index: {}]   ;;  %s1374_s9 = inlined_call_operand.hbm [shape: f32[1,35], index: 9, kind: input, shape index: {}]   ;;  %s1375_s10 = inlined_call_operand.vmem [shape: f32[35,40], index: 10, kind: input, shape index: {}]   ;;  %s1376_s11 = inlined_call_operand.vmem [shape: f32[1,40], index: 11, kind: input, shape index: {}]   ;;  %s1377_s12 = inlined_call_operand.hbm [shape: f32[40,43], index: 12, kind: input, shape index: {}]   ;;  %s1378_s13 = inlined_call_operand.vmem [shape: f32[1,43], index: 13, kind: input, shape index: {}]   ;;  %s1379_s14 = inlined_call_operand.hbm [shape: f32[8,128], index: 14, kind: output, shape index: {}]  }
   0x1   :  { %20 = vsyncpa [#allocation6], 0 }
   0x2   :  { %21 = vsyncpa [#allocation9], 0 }
   0x3   :  { %22 = vsyncpa [#allocation12], 0 }
   0x4   :  { %23 = vsyncpa [#allocation4], 0  ;;  %s1054_s29 = smov [#allocation5]   ;;  %s1055_s15 = smov [#allocation8]  }
   0x5   :  { %s40_s30 = sshll.u32 %s1054_s29, 4  ;;  %s69_s16 = sshll.u32 %s1055_s15, 4  ;;  %s41_s30 = int_to_ptr.vmem [resolvable:$true] %s40_s30  ;;  %s1145_s16 = int_to_ptr.vmem [resolvable:$true] %s69_s16 }
   0x6   :  { %s890_s19 = scalar_lea.hbm %s1366_s1, 128 }
   0x7   :  { %p891_p0 = scmp.ne.s32.totalorder %s1366_s1, %s890_s19  ;;  %p894_p1 = scmp.lt.u32.totalorder %s890_s19, %s1366_s1 }
   0x9   :  { %p896_p2 = pnand %p894_p1, %p891_p0 }
   0xb   :  { %899 = shalt.err (!%p896_p2)
}
   0xc   :  { %s900_s24 = scalar_lea.vmem %s41_s30, 128  ;;  %p905_p4 = scmp.lt.s32.totalorder %s41_s30, %s41_s30 }
   0xd   :  { %p901_p3 = scmp.ne.s32.totalorder %s41_s30, %s900_s24  ;;  %p906_p5 = scmp.lt.s32.totalorder %s900_s24, %s900_s24 }
   0xf   :  { %p907_p6 = por %p906_p5, %p905_p4 }
  0x11   :  { %p908_p7 = pnand %p907_p6, %p901_p3 }
  0x13   :  { %911 = shalt.err (!%p908_p7)
}
  0x14   :  { %43 = dma.hbm_to_vmem [thread:$0]  %s1366_s1, 128, %s41_s30, [#allocation6]  }
  0x15   :  { %s912_s29 = scalar_lea.hbm %s1373_s8, 512 }
  0x16   :  { %p913_p8 = scmp.ne.s32.totalorder %s1373_s8, %s912_s29  ;;  %p916_p9 = scmp.lt.u32.totalorder %s912_s29, %s1373_s8 }
  0x18   :  { %p918_p10 = pnand %p916_p9, %p913_p8 }
  0x1a   :  { %921 = shalt.err (!%p918_p10)
}
  0x1b   :  { %s922_s20 = scalar_lea.vmem %s1145_s16, 512  ;;  %p927_p12 = scmp.lt.s32.totalorder %s1145_s16, %s1145_s16 }
  0x1c   :  { %p923_p11 = scmp.ne.s32.totalorder %s1145_s16, %s922_s20  ;;  %p928_p13 = scmp.lt.s32.totalorder %s922_s20, %s922_s20 }
  0x1e   :  { %p929_p0 = por %p928_p13, %p927_p12 }
  0x20   :  { %p930_p1 = pnand %p929_p0, %p923_p11 }
  0x22   :  { %933 = shalt.err (!%p930_p1)
}
  0x23   :  { %s1056_s1 = smov 128   ;;  %s1057_s30 = smov 8  }
  0x24   :  { %75 = dma.hbm_to_vmem [thread:$0]  %s1373_s8, 512, %s1145_s16, [#allocation9], %s1056_s1, %s1056_s1, %s1057_s30  }
  0x25   :  { %s1058_s23 = smov [#allocation2]   ;;  %s1059_s25 = smov [#allocation7]  }
  0x26   :  { %s30_s24 = sshll.u32 %s1058_s23, 4  ;;  %s60_s26 = sshll.u32 %s1059_s25, 4  ;;  %s31_s24 = int_to_ptr.vmem [resolvable:$true] %s30_s24  ;;  %s61_s26 = int_to_ptr.vmem [resolvable:$true] %s60_s26 }
  0x27   :  { %s934_s29 = scalar_lea.hbm %s1365_s0, 128 }
  0x28   :  { %p935_p2 = scmp.ne.s32.totalorder %s1365_s0, %s934_s29  ;;  %p938_p3 = scmp.lt.u32.totalorder %s934_s29, %s1365_s0 }
  0x2a   :  { %p940_p4 = pnand %p938_p3, %p935_p2 }
  0x2c   :  { %943 = shalt.err (!%p940_p4)
}
  0x2d   :  { %s944_s8 = scalar_lea.vmem %s31_s24, 128  ;;  %p949_p6 = scmp.lt.s32.totalorder %s31_s24, %s31_s24 }
  0x2e   :  { %p945_p5 = scmp.ne.s32.totalorder %s31_s24, %s944_s8  ;;  %p950_p7 = scmp.lt.s32.totalorder %s944_s8, %s944_s8 }
  0x30   :  { %p951_p8 = por %p950_p7, %p949_p6 }
  0x32   :  { %p952_p9 = pnand %p951_p8, %p945_p5 }
  0x34   :  { %955 = shalt.err (!%p952_p9)
}
  0x35   :  { %33 = dma.hbm_to_vmem [thread:$0]  %s1365_s0, 128, %s31_s24, [#allocation3]  }
  0x36   :  { %s956_s23 = scalar_lea.hbm %s1372_s7, 16 }
  0x37   :  { %p957_p10 = scmp.ne.s32.totalorder %s1372_s7, %s956_s23  ;;  %p960_p11 = scmp.lt.u32.totalorder %s956_s23, %s1372_s7 }
  0x39   :  { %p962_p12 = pnand %p960_p11, %p957_p10 }
  0x3b   :  { %965 = shalt.err (!%p962_p12)
}
  0x3c   :  { %s966_s15 = scalar_lea.vmem %s61_s26, 16  ;;  %s970_s17 = scalar_lea.vmem %s61_s26, 32 }
  0x3d   :  { %p967_p13 = scmp.ne.s32.totalorder %s61_s26, %s966_s15  ;;  %p971_p0 = scmp.lt.s32.totalorder %s61_s26, %s61_s26 }
  0x3e   :  { %p972_p1 = scmp.lt.s32.totalorder %s970_s17, %s966_s15 }
  0x40   :  { %p973_p2 = por %p972_p1, %p971_p0 }
  0x42   :  { %p974_p3 = pnand %p973_p2, %p967_p13 }
  0x44   :  { %977 = shalt.err (!%p974_p3)
}
  0x45   :  { %63 = dma.hbm_to_vmem [thread:$0]  %s1372_s7, 16, %s61_s26, [#allocation6]  }
  0x46   :  { %s1060_s18 = smov [#allocation10]   ;;  %s1061_s8 = smov [#allocation11]  }
  0x47   :  { %s82_s19 = sshll.u32 %s1060_s18, 4  ;;  %s95_s16 = sshll.u32 %s1061_s8, 4  ;;  %s83_s19 = int_to_ptr.vmem [resolvable:$true] %s82_s19  ;;  %s1203_s16 = int_to_ptr.vmem [resolvable:$true] %s95_s16 }
  0x48   :  { %s978_s22 = scalar_lea.hbm %s1374_s9, 16 }
  0x49   :  { %p979_p4 = scmp.ne.s32.totalorder %s1374_s9, %s978_s22  ;;  %p982_p5 = scmp.lt.u32.totalorder %s978_s22, %s1374_s9 }
  0x4b   :  { %p984_p6 = pnand %p982_p5, %p979_p4 }
  0x4d   :  { %987 = shalt.err (!%p984_p6)
}
  0x4e   :  { %s988_s7 = scalar_lea.vmem %s83_s19, 16  ;;  %s992_s26 = scalar_lea.vmem %s83_s19, 32 }
  0x4f   :  { %p989_p7 = scmp.ne.s32.totalorder %s83_s19, %s988_s7  ;;  %p993_p8 = scmp.lt.s32.totalorder %s83_s19, %s83_s19 }
  0x50   :  { %p994_p9 = scmp.lt.s32.totalorder %s992_s26, %s988_s7 }
  0x52   :  { %p995_p10 = por %p994_p9, %p993_p8 }
  0x54   :  { %p996_p11 = pnand %p995_p10, %p989_p7 }
  0x56   :  { %999 = shalt.err (!%p996_p11)
}
  0x57   :  { %85 = dma.hbm_to_vmem [thread:$0]  %s1374_s9, 16, %s83_s19, [#allocation9]  }
  0x58   :  { %s1000_s24 = scalar_lea.hbm %s1377_s12, 640 }
  0x59   :  { %p1001_p12 = scmp.ne.s32.totalorder %s1377_s12, %s1000_s24  ;;  %p1004_p13 = scmp.lt.u32.totalorder %s1000_s24, %s1377_s12 }
  0x5b   :  { %p1006_p0 = pnand %p1004_p13, %p1001_p12 }
  0x5d   :  { %1009 = shalt.err (!%p1006_p0)
}
  0x5e   :  { %s1010_s22 = scalar_lea.vmem %s1203_s16, 640  ;;  %p1015_p2 = scmp.lt.s32.totalorder %s1203_s16, %s1203_s16 }
  0x5f   :  { %p1011_p1 = scmp.ne.s32.totalorder %s1203_s16, %s1010_s22  ;;  %p1016_p3 = scmp.lt.s32.totalorder %s1010_s22, %s1010_s22 }
  0x61   :  { %p1017_p4 = por %p1016_p3, %p1015_p2 }
  0x63   :  { %p1018_p5 = pnand %p1017_p4, %p1011_p1 }
  0x65   :  { %1021 = shalt.err (!%p1018_p5)
}
  0x66   :  { %101 = dma.hbm_to_vmem [thread:$0]  %s1377_s12, 640, %s1203_s16, [#allocation12], %s1056_s1, %s1056_s1, %s1057_s30  }
  0x67   :  { %1044 = dma.done.wait [#allocation3], 128  }
  0x68   :  { %1045 = vsyncadd [#allocation3], 4294967168 }
  0x69   :  { %1046 = dma.done.wait [#allocation6], 144  }
  0x6a   :  { %1047 = vsyncadd [#allocation6], 4294967152 }
  0x6b   :  { %1048 = dma.done.wait [#allocation9], 528  }
  0x6c   :  { %1049 = vsyncadd [#allocation9], 4294966768 }
  0x6d   :  { %1050 = dma.done.wait [#allocation12], 640  }
  0x6e   :  { %1051 = vsyncadd [#allocation12], 4294966656  ;;  %v1062_v0 = vmov 0.0|0.0   ;;  %vm1063_vm0 = vmmov 0   ;;  %v1064_v1 = vmov 0.0   ;;  %v123_v2 = vld [vmem:[%s1367_s2] sm:$0xff] }
  0x6f   :  { %831 = vmatprep.subr.bf16.mxu0 %v1062_v0  ;;  %841 = vmatprep.subr.bf16.mxu1 %v1062_v0  ;;  %669 = vst [vmem:[#allocation13] sm:$0xff] %v1064_v1  ;;  %v124_v3 = vld [vmem:[%s1367_s2 + $0x8] sm:$0xff]  ;;  %v125_v4 = vld [vmem:[%s1367_s2 + $0x10] sm:$0xff]  ;;  %v126_v6 = vld [vmem:[%s1367_s2 + $0x18] sm:$0xff]  ;;  %vm140_vm1 = vcmask 1042432   ;;  %vm1065_vm2 = vmmov 1  }
  0x70   :  { %765 = vmatprep.mubr.msk.f32.mxu0 %vm1063_vm0, %v1064_v1  ;;  %778 = vmatprep.mubr.msk.f32.mxu1 %vm1063_vm0, %v1064_v1  ;;  %v832_v5 = vpack.c.bf16 %v124_v3, %v123_v2  ;;  %v215_v7 = vld [vmem:[%s1369_s4] sm:$0xff]  ;;  %v216_v8 = vld [vmem:[%s1369_s4 + $0x8] sm:$0xff]  ;;  %v835_v9 = vpack.c.bf16 %v126_v6, %v125_v4  ;;  %vm839_vm3 = vmpackc.low %vm140_vm1, %vm1065_vm2  ;;  %vm136_vm4 = vcmask 351232   ;;  %vm227_vm5 = vcmask 326656   ;;  %s1066_s26 = smov 30   ;;  %s1069_s30 = smov [#allocation13]  }
  0x71   :  { %v842_v10 = vpack.c.bf16 %v216_v8, %v215_v7  ;;  %v127_v11 = vld [vmem:[%s1367_s2 + $0x20] sm:$0xff]  ;;  %v128_v12 = vld [vmem:[%s1367_s2 + $0x28] sm:$0x7]  ;;  %v217_v15 = vld [vmem:[%s1369_s4 + $0x10] sm:$0xff]  ;;  %vm314_vm6 = vcmask 285696   ;;  %vm420_vm7 = vcmask 1045504  }
  0x72   :  { %833 = vmatpush3.bf16.msra.mxu0 %v832_v5  ;;  %v838_v13 = vpack.c.bf16 %v128_v12, %v127_v11  ;;  %v122_v14 = vld [vmem:[#allocation2] sm:$0xff]  ;;  %v218_v16 = vld [vmem:[%s1369_s4 + $0x18] sm:$0xff]  ;;  %v303_v21 = vld [vmem:[%s1371_s6 + $0x8] sm:$0xff]  ;;  %vm416_vm9 = vcmask 244736   ;;  %s689_s16 = sshll.u32 %s1069_s30, 4  ;;  %vm675_vm10 = vcmask 597336   ;;  %s690_s16 = int_to_ptr.vmem [resolvable:$true] %s689_s16 }
  0x73   :  { %834 = vmatprep.subr.bf16.mxu0 %v1062_v0  ;;  %843 = vmatpush3.bf16.msra.mxu1 %v842_v10  ;;  %v845_v17 = vpack.c.bf16 %v218_v16, %v217_v15  ;;  %v219_v18 = vld [vmem:[%s1369_s4 + $0x20] sm:$0xff]  ;;  %v304_v27 = vld [vmem:[%s1371_s6 + $0x10] sm:$0xff]  ;;  %v305_v28 = vld [vmem:[%s1371_s6 + $0x18] sm:$0xff]  ;;  %vm681_vm11 = vcmask 843336   ;;  %p1027_p7 = scmp.lt.s32.totalorder %s690_s16, %s690_s16 }
  0x74   :  { %844 = vmatprep.subr.bf16.mxu1 %v1062_v0  ;;  %v701_v19 = vld [vmem:[%s1368_s3] ss:$0 sm:$0xff]  ;;  %v851_v29 = vpack.c.bf16 %v305_v28, %v304_v27  ;;  %v394_v31 = vld [vmem:[#allocation5] sm:$0xff]  ;;  %v405_v37 = vld [vmem:[#allocation8] sm:$0xff] }
  0x75   :  { %v302_v20 = vld [vmem:[%s1371_s6] sm:$0xff]  ;;  %396 = vrot.lane.b32.xlu0 %v394_v31, %s1066_s26  ;;  %v706_v40 = vld [vmem:[#allocation7] ss:$0 sm:$0xff]  ;;  %vm858_vm8 = vmpackc.low %vm420_vm7, %vm1065_vm2 }
  0x76   :  { %836 = vmatpush3.bf16.msra.mxu0 %v835_v9  ;;  %v848_v25 = vpack.c.bf16 %v303_v21, %v302_v20  ;;  %v306_v30 = vld [vmem:[%s1371_s6 + $0x20] sm:$0x7]  ;;  %v408_v46 = vld [vmem:[#allocation8 + $0x18] sm:$0x3f]  ;;  %s1068_s6 = smov 98   ;;  %v496_v57 = vld [vmem:[%s1375_s10 + $0x10] sm:$0xff] }
  0x77   :  { %837 = vmatprep.subr.bf16.mxu0 %v1062_v0  ;;  %846 = vmatpush3.bf16.msra.mxu1 %v845_v17  ;;  %v704_v32 = vld [vmem:[%s1370_s5] ss:$0 sm:$0xff]  ;;  %s1067_s5 = smov 43   ;;  %v407_v45 = vld [vmem:[#allocation8 + $0x10] sm:$0xff]  ;;  %v497_v58 = vld [vmem:[%s1375_s10 + $0x18] sm:$0xff] }
  0x78   :  { %776 = vmatprep.subr.mxu1 %v1064_v1  ;;  %v406_v38 = vld [vmem:[#allocation8 + $0x8] sm:$0xff]  ;;  %v857_v47 = vpack.c.bf16 %v408_v46, %v407_v45  ;;  %v495_v53 = vld [vmem:[%s1375_s10 + $0x8] sm:$0xff]  ;;  %v864_v59 = vpack.c.bf16 %v497_v58, %v496_v57  ;;  %v709_v2 = vld [vmem:[#allocation10] ss:$0 sm:$0xff] }
  0x79   :  { %v854_v39 = vpack.c.bf16 %v406_v38, %v405_v37  ;;  %v494_v52 = vld [vmem:[%s1375_s10] sm:$0xff]  ;;  %v583_v61 = vld [vmem:[#allocation11] sm:$0xff]  ;;  %v586_v7 = vld [vmem:[#allocation11 + $0x18] sm:$0xff] }
  0x7a   :  { %840 = vmatpush3.bf16.msk.msra.mxu0 %vm839_vm3, %v838_v13  ;;  %v861_v55 = vpack.c.bf16 %v495_v53, %v494_v52  ;;  %v498_v60 = vld [vmem:[%s1375_s10 + $0x20] sm:$0x7]  ;;  %v585_v6 = vld [vmem:[#allocation11 + $0x10] sm:$0xff]  ;;  %v587_v9 = vld [vmem:[#allocation11 + $0x20] sm:$0xff] }
  0x7b   :  { %853 = vmatprep.subr.bf16.mxu0 %v1062_v0  ;;  %777 = vmatpush3.msra.mxu1 %v219_v18  ;;  %v584_v62 = vld [vmem:[#allocation11 + $0x8] sm:$0xff]  ;;  %v870_v8 = vpack.c.bf16 %v586_v7, %v585_v6 }
  0x7c   :  { %847 = vmatprep.subr.bf16.mxu1 %v1062_v0  ;;  %v867_v63 = vpack.c.bf16 %v584_v62, %v583_v61  ;;  %v712_v10 = vld [vmem:[%s1376_s11] ss:$0 sm:$0xff]  ;;  %s1022_s11 = scalar_lea.vmem %s690_s16, 128 }
  0x7d   :  { %766 = vmatmul.mubr.msk.f32.vlgmr.msra.gmra.mrb[0].mxu0 %vm136_vm4, %v122_v14  ;;  %v715_v14 = vld [vmem:[%s1378_s13] ss:$0 sm:$0xff]  ;;  %p1023_p6 = scmp.ne.s32.totalorder %s690_s16, %s1022_s11  ;;  %p1028_p8 = scmp.lt.s32.totalorder %s1022_s11, %s1022_s11 }
  0x7e   :  { %802 = vmatprep.mubr.msk.f32.mxu0 %vm1063_vm0, %v1064_v1  ;;  %855 = vmatpush3.bf16.msra.mxu0 %v854_v39 }
  0x7f   :  { %856 = vmatprep.subr.bf16.mxu0 %v1062_v0  ;;  %p1029_p9 = por %p1028_p8, %p1027_p7 }
  0x81   :  { %p1030_p10 = pnand %p1029_p9, %p1023_p6 }
  0x82   :  { %859 = vmatpush3.bf16.msk.msra.mxu0 %vm858_vm8, %v857_v47 }
  0x83   :  { %860 = vmatprep.subr.bf16.mxu0 %v1062_v0 }
  0xe7   :  { %v397_v49 = vpop.permute.xlu0 %396 }
 0x150   :  { %v210_v22 = vpop.f32.mrb[0].mxu0 }
 0x151   :  { %v211_v23 = vadd.f32 %v701_v19, %v210_v22  ;;  %v767_v24 = vpop.f32.mrb[1].mxu0 }
 0x153   :  { %v214_v26 = vmax.f32 %v211_v23, 0.0 }
 0x155   :  { %779 = vmatmul.mubr.msk.f32.vlgmr.msra.gmra.mrb[0].mxu1 %vm227_vm5, %v214_v26 }
 0x156   :  { %849 = vmatpush3.bf16.msra.mxu1 %v848_v25  ;;  %791 = vmatprep.mubr.msk.f32.mxu1 %vm1063_vm0, %v1064_v1 }
 0x157   :  { %850 = vmatprep.subr.bf16.mxu1 %v1062_v0 }
 0x15a   :  { %852 = vmatpush3.bf16.msra.mxu1 %v851_v29 }
 0x15b   :  { %789 = vmatprep.subr.mxu1 %v1064_v1 }
 0x15e   :  { %790 = vmatpush3.msk.msra.mxu1 %vm140_vm1, %v306_v30 }
 0x15f   :  { %866 = vmatprep.subr.bf16.mxu1 %v1062_v0 }
 0x228   :  { %v297_v33 = vpop.f32.mrb[0].mxu1 }
 0x229   :  { %v298_v34 = vadd.f32 %v704_v32, %v297_v33  ;;  %v780_v35 = vpop.f32.mrb[1].mxu1 }
 0x22b   :  { %v301_v36 = vmax.f32 %v298_v34, 0.0 }
 0x22d   :  { %792 = vmatmul.mubr.msk.f32.vlgmr.msra.gmra.mrb[2].mxu1 %vm314_vm6, %v301_v36 }
 0x22e   :  { %828 = vmatprep.mubr.msk.f32.mxu1 %vm1063_vm0, %v1064_v1  ;;  %868 = vmatpush3.bf16.msra.mxu1 %v867_v63 }
 0x22f   :  { %869 = vmatprep.subr.bf16.mxu1 %v1062_v0 }
 0x232   :  { %871 = vmatpush3.bf16.msra.mxu1 %v870_v8 }
 0x233   :  { %826 = vmatprep.subr.mxu1 %v1064_v1 }
 0x236   :  { %827 = vmatpush3.msra.mxu1 %v587_v9 }
 0x300   :  { %v387_v41 = vpop.f32.mrb[2].mxu1 }
 0x301   :  { %v388_v42 = vadd.f32 %v706_v40, %v387_v41  ;;  %v793_v43 = vpop.f32.mrb[3].mxu1 }
 0x303   :  { %v391_v44 = vmul.f32 0.5, %v388_v42  ;;  %672 = vrot.lane.b32.xlu1 %v388_v42, %s1067_s5 }
 0x305   :  { %v392_v48 = vmul.f32 1.442695, %v391_v44 }
 0x307   :  { %888 = vpow2.f32 %v392_v48 }
 0x311   :  { %v889_v50 = vpop.eup %888 }
 0x312   :  { %v399_v51 = vmul.f32 %v889_v50, %v397_v49  ;;  %678 = vrot.lane.b32.xlu1 %v889_v50, %s1067_s5 }
 0x314   :  { %401 = vrot.lane.b32.xlu0 %v399_v51, %s1068_s6 }
 0x386   :  { %v402_v54 = vpop.permute.xlu0 %401 }
 0x387   :  { %v404_v56 = vadd.f32 %v402_v54, %v388_v42 }
 0x389   :  { %803 = vmatmul.mubr.msk.f32.vlgmr.msra.gmra.mrb[2].mxu0 %vm416_vm9, %v404_v56 }
 0x38a   :  { %862 = vmatpush3.bf16.msra.mxu0 %v861_v55  ;;  %815 = vmatprep.mubr.msk.f32.mxu0 %vm1063_vm0, %v1064_v1 }
 0x38b   :  { %863 = vmatprep.subr.bf16.mxu0 %v1062_v0 }
 0x38e   :  { %865 = vmatpush3.bf16.msra.mxu0 %v864_v59 }
 0x38f   :  { %813 = vmatprep.subr.mxu0 %v1064_v1  ;;  %v673_v1 = vpop.permute.xlu1 %672 }
 0x392   :  { %814 = vmatpush3.msk.msra.mxu0 %vm140_vm1, %v498_v60 }
 0x393   :  { %v679_v19 = vpop.permute.xlu1 %678 }
 0x45c   :  { %v490_v3 = vpop.f32.mrb[2].mxu0 }
 0x45d   :  { %v491_v4 = vadd.f32 %v709_v2, %v490_v3  ;;  %v804_v5 = vpop.f32.mrb[3].mxu0 }
 0x45f   :  { %816 = vmatmul.mubr.msk.f32.vlgmr.msra.gmra.mrb[4].mxu0 %vm314_vm6, %v491_v4 }
 0x532   :  { %v578_v11 = vpop.f32.mrb[4].mxu0 }
 0x533   :  { %v579_v0 = vadd.f32 %v712_v10, %v578_v11  ;;  %v817_v12 = vpop.f32.mrb[5].mxu0 }
 0x535   :  { %v582_v13 = vmax.f32 %v579_v0, 0.0 }
 0x537   :  { %829 = vmatmul.mubr.msk.f32.vlgmr.msra.gmra.mrb[4].mxu1 %vm227_vm5, %v582_v13 }
 0x60a   :  { %v664_v15 = vpop.f32.mrb[4].mxu1 }
 0x60b   :  { %v665_v16 = vadd.f32 %v715_v14, %v664_v15  ;;  %v830_v17 = vpop.f32.mrb[5].mxu1 }
 0x60d   :  { %v668_v18 = vmax.f32 %v665_v16, 0.0 }
 0x60f   :  { %670 = vst.msk [vmem:[#allocation13] sm:$0xff] %vm136_vm4, %v668_v18 }
 0x610   :  { %676 = vst.msk [vmem:[#allocation13] sm:$0xff] %vm675_vm10, %v673_v1 }
 0x611   :  { %682 = vst.msk [vmem:[#allocation13] sm:$0xff] %vm681_vm11, %v679_v19 }
 0x612   :  { %1033 = shalt.err (!%p1030_p10)
}
 0x613   :  { %s1034_s3 = scalar_lea.hbm %s1379_s14, 128 }
 0x614   :  { %p1035_p11 = scmp.ne.s32.totalorder %s1379_s14, %s1034_s3  ;;  %p1038_p12 = scmp.lt.u32.totalorder %s1034_s3, %s1379_s14 }
 0x616   :  { %p1040_p13 = pnand %p1038_p12, %p1035_p11 }
 0x618   :  { %1043 = shalt.err (!%p1040_p13)
}
 0x619   :  { %692 = dma.vmem_to_hbm [thread:$0]  %s690_s16, 128, %s1379_s14, [#allocation4]  }
 0x61a   :  { %1052 = dma.done.wait [#allocation4], 128  }
 0x61b   :  { %1053 = vsyncadd [#allocation4], 4294967168 }
 0x61c   :  { %696 = vsyncpa [#allocation3], 1 }
 0x61d   :  { %697 = vsyncpa [#allocation6], 1 }
 0x61e   :  { %698 = vsyncpa [#allocation9], 1 }
 0x61f   :  { %699 = vsyncpa [#allocation12], 1 }
 0x620   :  { %700 = vsyncpa [#allocation4], 1 }

</bundles_post_ra>
